<compile_context>
chip_gen: v7x
topology: tpu7x:2x2x1
jax: 0.10.0
libtpu: 0.0.40
codegen_flags: <defaults>
</compile_context>

<pallas_src>
import jax
import jax.numpy as jnp
from jax.experimental import pallas as pl
from jax.experimental.pallas import tpu as pltpu


# ---------------------------------------------------------------------------
# Pallas kernel:
#   x[b]   = [emb[ids[b]], 1]                      (gather, ones col folds b1)
#   h      = gelu(x @ [[w1],[b1]])                 (bf16 MXU, f32 accum)
#   logits = h @ w2 + b2                           (bf16 MXU, f32 accum)
# ---------------------------------------------------------------------------
def _last_token_logits_kernel(ids_ref, emb_ref, w1_ref, w2_ref, b2_ref,
                              o_ref, x_scr):
    # ids: (B_pad,) i32 SMEM | emb: (V, H+1) f32 | w1: (H+1, F) bf16
    # w2: (F, V) bf16 | b2: (1, V) f32 | o: (B_pad, V) f32 | x_scr: (B_pad, H+1) f32
    b_pad = o_ref.shape[0]

    # Direct row gather from the VMEM-resident table: B_pad dynamic-row loads,
    # statically unrolled (scalar index comes from SMEM). No one-hot matmul.
    for b in range(b_pad):
        idx = ids_ref[b]                                         # scalar int32
        x_scr[pl.ds(b, 1), :] = emb_ref[pl.ds(idx, 1), :]        # (1, H+1)

    x = x_scr[...].astype(jnp.bfloat16)                          # (B_pad, H+1)

    # Hidden layer: bf16 operands, f32 accumulation; b1 is folded into w1_ref.
    h = jnp.dot(x, w1_ref[...], preferred_element_type=jnp.float32)  # (B_pad, F)
    # Synthetic model uses tanh-approximate GELU (== nn.GELU(approximate='tanh')).
    # TODO(synk): use jax.nn.gelu(h, approximate=False) if the wrapped PyTorch
    # model uses the default exact-erf nn.GELU().
    h = jax.nn.gelu(h)

    # LM head.
    logits = jnp.dot(h.astype(jnp.bfloat16), w2_ref[...],
                     preferred_element_type=jnp.float32)             # (B_pad, V)
    o_ref[...] = (logits + b2_ref[...]).astype(o_ref.dtype)


def last_token_logits_pallas(last_ids, emb_aug, w1_aug, w2_bf16, b2):
    """last_ids: int32 [B] -> logits [B, V] for the final position only."""
    B = last_ids.shape[0]
    V, H_aug = emb_aug.shape
    F = w1_aug.shape[1]

    # Pad the row count to a multiple of 8 (f32 sublane) for unmasked stores
    # and better MXU M-occupancy; padded rows reuse token id 0 and are sliced off.
    B_pad = max(8, ((B + 7) // 8) * 8)
    ids_pad = jnp.zeros((B_pad,), jnp.int32).at[:B].set(last_ids.astype(jnp.int32))

    vmem = pl.BlockSpec(memory_space=pltpu.MemorySpace.VMEM)
    smem = pl.BlockSpec(memory_space=pltpu.MemorySpace.SMEM)
    cost = pl.CostEstimate(
        flops=2 * B_pad * (H_aug * F + F * V),
        transcendentals=B_pad * F,
        bytes_accessed=(4 * B_pad                # ids (i32)
                        + 4 * V * H_aug          # embedding (+ones col), f32
                        + 2 * H_aug * F          # w1 (+b1 row), bf16
                        + 2 * F * V              # w2, bf16
                        + 4 * V                  # b2, f32
                        + 4 * B_pad * V),        # logits out, f32
    )

    # Everything fits comfortably in VMEM at these sizes -> single invocation.
    # TODO(synk): at real model sizes, add a (row-tile x vocab-tile) grid with
    # dimension_semantics=("parallel", "parallel"), vocab tiles a multiple of
    # 128, and tile sizes derived from pltpu.get_tpu_info() / vmem_limit_bytes.
    out = pl.pallas_call(
        _last_token_logits_kernel,
        out_shape=jax.ShapeDtypeStruct((B_pad, V), jnp.float32),
        in_specs=[smem, vmem, vmem, vmem, vmem],
        out_specs=vmem,
        scratch_shapes=[pltpu.VMEM((B_pad, H_aug), jnp.float32)],
        cost_estimate=cost,
    )(ids_pad, emb_aug, w1_aug, w2_bf16, b2)
    return out[:B]


# ---------------------------------------------------------------------------
# One-time parameter preparation (pre-cast / fold biases outside the kernel)
# ---------------------------------------------------------------------------
def prepare_kernel_params(params):
    emb = params["embedding"].astype(jnp.float32)
    V, _ = emb.shape
    # Ones column on the embedding + b1 row on w1 folds the hidden bias into
    # the first matmul (one fewer kernel operand / DMA descriptor).
    emb_aug = jnp.concatenate([emb, jnp.ones((V, 1), jnp.float32)], axis=1)
    w1_aug = jnp.concatenate([params["w1"], params["b1"]],
                             axis=0).astype(jnp.bfloat16)
    return {
        "emb_aug": emb_aug,                                   # (V, H+1) f32
        "w1_aug": w1_aug,                                     # (H+1, F) bf16
        "w2": params["w2"].astype(jnp.bfloat16),              # (F, V)  bf16
        "b2": params["b2"].astype(jnp.float32),               # (1, V)  f32
    }


# ---------------------------------------------------------------------------
# ModelWrapper.forward equivalent
# ---------------------------------------------------------------------------
def model_wrapper_forward(prepared, input_ids, attention_mask=None):
    """Reproduces: return self.model(input_ids).logits[:, -1]

    input_ids: int32 [B, S]; attention_mask is accepted but unused, matching
    the PyTorch wrapper (the wrapped model is called without it).
    """
    del attention_mask
    V = prepared["emb_aug"].shape[0]
    # Clamp ids so the dynamic-row gather can never read out of the table.
    last_ids = jnp.clip(input_ids[:, -1], 0, V - 1).astype(jnp.int32)   # [B]
    return last_token_logits_pallas(
        last_ids, prepared["emb_aug"], prepared["w1_aug"],
        prepared["w2"], prepared["b2"])                                  # [B, V]


# ---------------------------------------------------------------------------
# Deterministic parameter init (synthetic "model")
# ---------------------------------------------------------------------------
def init_params(key, vocab=128, hidden=32, ff=64):
    k_emb, k_w1, k_w2 = jax.random.split(key, 3)
    return {
        "embedding": jax.random.normal(k_emb, (vocab, hidden), jnp.float32) * 0.02,
        "w1": jax.random.normal(k_w1, (hidden, ff), jnp.float32) * 0.05,
        "b1": jnp.zeros((1, ff), jnp.float32),
        "w2": jax.random.normal(k_w2, (ff, vocab), jnp.float32) * 0.05,
        "b2": jnp.zeros((1, vocab), jnp.float32),
    }


if __name__ == "__main__":
    key = jax.random.PRNGKey(0)
    k_params, k_ids = jax.random.split(key)

    B, S, V, H, F = 2, 8, 128, 32, 64
    params = init_params(k_params, vocab=V, hidden=H, ff=F)
    prepared = prepare_kernel_params(params)
    input_ids = jax.random.randint(k_ids, (B, S), 0, V, dtype=jnp.int32)
    attention_mask = jnp.ones((B, S), jnp.int32)                  # accepted, unused

    out = model_wrapper_forward(prepared, input_ids, attention_mask)
    out = jax.block_until_ready(out)
    assert out.shape == (B, V)

    # Reference 1: same math / same bf16 operand policy in plain JAX (tight tol).
    last_ids = input_ids[:, -1]
    x_aug = jnp.concatenate(
        [params["embedding"][last_ids], jnp.ones((B, 1), jnp.float32)],
        axis=1).astype(jnp.bfloat16)
    hb = jnp.dot(x_aug, prepared["w1_aug"], preferred_element_type=jnp.float32)
    hb = jax.nn.gelu(hb)
    ref_bf16 = jnp.dot(hb.astype(jnp.bfloat16), prepared["w2"],
                       preferred_element_type=jnp.float32) + params["b2"]
    assert jnp.allclose(out, ref_bf16, atol=1e-4, rtol=1e-3)

    # Reference 2: full-f32 whole-sequence forward sliced to the last position
    # (exact PyTorch-wrapper semantics); loose tol because of bf16 operands.
    x32 = jnp.take(params["embedding"], input_ids.reshape(-1), axis=0)
    ref32 = jax.nn.gelu(x32 @ params["w1"] + params["b1"]) @ params["w2"] + params["b2"]
    ref32 = ref32.reshape(B, S, V)[:, -1]
    assert jnp.allclose(out, ref32, atol=2e-2, rtol=2e-2)

    print("KERNEL_OK")
</pallas_src>

<mosaic_0001>
module attributes {stable_mosaic.version = 11 : i64} {
  func.func @_last_token_logits_kernel(%arg0: memref<8xi32, #tpu.memory_space<smem>>, %arg1: memref<128x33xf32, #tpu.memory_space<vmem>>, %arg2: memref<33x64xbf16, #tpu.memory_space<vmem>>, %arg3: memref<64x128xbf16, #tpu.memory_space<vmem>>, %arg4: memref<1x128xf32, #tpu.memory_space<vmem>>, %arg5: memref<8x128xf32, #tpu.memory_space<vmem>>, %arg6: memref<8x33xf32, #tpu.memory_space<vmem>>) attributes {dimension_semantics = [], scalar_prefetch = 0 : i64, scratch_operands = 1 : i64, tpu.core_type = #tpu.core_type<tc>} {
    %c0 = arith.constant 0 : index
    %0 = memref.load %arg0[%c0] : memref<8xi32, #tpu.memory_space<smem>>
    %1 = arith.index_cast %0 : i32 to index
    %c0_0 = arith.constant 0 : index
    %2 = vector.load %arg1[%1, %c0_0] : memref<128x33xf32, #tpu.memory_space<vmem>>, vector<1x33xf32>
    %c0_1 = arith.constant 0 : index
    %c0_2 = arith.constant 0 : index
    %3 = vector.load %arg6[%c0_1, %c0_2] : memref<8x33xf32, #tpu.memory_space<vmem>>, vector<1x33xf32>
    tpu.vector_store %arg6[%c0_1, %c0_2], %2 {strides = array<i32>} : memref<8x33xf32, #tpu.memory_space<vmem>>, vector<1x33xf32>,
    %c1 = arith.constant 1 : index
    %4 = memref.load %arg0[%c1] : memref<8xi32, #tpu.memory_space<smem>>
    %5 = arith.index_cast %4 : i32 to index
    %c0_3 = arith.constant 0 : index
    %6 = vector.load %arg1[%5, %c0_3] : memref<128x33xf32, #tpu.memory_space<vmem>>, vector<1x33xf32>
    %c1_4 = arith.constant 1 : index
    %c0_5 = arith.constant 0 : index
    %7 = vector.load %arg6[%c1_4, %c0_5] : memref<8x33xf32, #tpu.memory_space<vmem>>, vector<1x33xf32>
    tpu.vector_store %arg6[%c1_4, %c0_5], %6 {strides = array<i32>} : memref<8x33xf32, #tpu.memory_space<vmem>>, vector<1x33xf32>,
    %c2 = arith.constant 2 : index
    %8 = memref.load %arg0[%c2] : memref<8xi32, #tpu.memory_space<smem>>
    %9 = arith.index_cast %8 : i32 to index
    %c0_6 = arith.constant 0 : index
    %10 = vector.load %arg1[%9, %c0_6] : memref<128x33xf32, #tpu.memory_space<vmem>>, vector<1x33xf32>
    %c2_7 = arith.constant 2 : index
    %c0_8 = arith.constant 0 : index
    %11 = vector.load %arg6[%c2_7, %c0_8] : memref<8x33xf32, #tpu.memory_space<vmem>>, vector<1x33xf32>
    tpu.vector_store %arg6[%c2_7, %c0_8], %10 {strides = array<i32>} : memref<8x33xf32, #tpu.memory_space<vmem>>, vector<1x33xf32>,
    %c3 = arith.constant 3 : index
    %12 = memref.load %arg0[%c3] : memref<8xi32, #tpu.memory_space<smem>>
    %13 = arith.index_cast %12 : i32 to index
    %c0_9 = arith.constant 0 : index
    %14 = vector.load %arg1[%13, %c0_9] : memref<128x33xf32, #tpu.memory_space<vmem>>, vector<1x33xf32>
    %c3_10 = arith.constant 3 : index
    %c0_11 = arith.constant 0 : index
    %15 = vector.load %arg6[%c3_10, %c0_11] : memref<8x33xf32, #tpu.memory_space<vmem>>, vector<1x33xf32>
    tpu.vector_store %arg6[%c3_10, %c0_11], %14 {strides = array<i32>} : memref<8x33xf32, #tpu.memory_space<vmem>>, vector<1x33xf32>,
    %c4 = arith.constant 4 : index
    %16 = memref.load %arg0[%c4] : memref<8xi32, #tpu.memory_space<smem>>
    %17 = arith.index_cast %16 : i32 to index
    %c0_12 = arith.constant 0 : index
    %18 = vector.load %arg1[%17, %c0_12] : memref<128x33xf32, #tpu.memory_space<vmem>>, vector<1x33xf32>
    %c4_13 = arith.constant 4 : index
    %c0_14 = arith.constant 0 : index
    %19 = vector.load %arg6[%c4_13, %c0_14] : memref<8x33xf32, #tpu.memory_space<vmem>>, vector<1x33xf32>
    tpu.vector_store %arg6[%c4_13, %c0_14], %18 {strides = array<i32>} : memref<8x33xf32, #tpu.memory_space<vmem>>, vector<1x33xf32>,
    %c5 = arith.constant 5 : index
    %20 = memref.load %arg0[%c5] : memref<8xi32, #tpu.memory_space<smem>>
    %21 = arith.index_cast %20 : i32 to index
    %c0_15 = arith.constant 0 : index
    %22 = vector.load %arg1[%21, %c0_15] : memref<128x33xf32, #tpu.memory_space<vmem>>, vector<1x33xf32>
    %c5_16 = arith.constant 5 : index
    %c0_17 = arith.constant 0 : index
    %23 = vector.load %arg6[%c5_16, %c0_17] : memref<8x33xf32, #tpu.memory_space<vmem>>, vector<1x33xf32>
    tpu.vector_store %arg6[%c5_16, %c0_17], %22 {strides = array<i32>} : memref<8x33xf32, #tpu.memory_space<vmem>>, vector<1x33xf32>,
    %c6 = arith.constant 6 : index
    %24 = memref.load %arg0[%c6] : memref<8xi32, #tpu.memory_space<smem>>
    %25 = arith.index_cast %24 : i32 to index
    %c0_18 = arith.constant 0 : index
    %26 = vector.load %arg1[%25, %c0_18] : memref<128x33xf32, #tpu.memory_space<vmem>>, vector<1x33xf32>
    %c6_19 = arith.constant 6 : index
    %c0_20 = arith.constant 0 : index
    %27 = vector.load %arg6[%c6_19, %c0_20] : memref<8x33xf32, #tpu.memory_space<vmem>>, vector<1x33xf32>
    tpu.vector_store %arg6[%c6_19, %c0_20], %26 {strides = array<i32>} : memref<8x33xf32, #tpu.memory_space<vmem>>, vector<1x33xf32>,
    %c7 = arith.constant 7 : index
    %28 = memref.load %arg0[%c7] : memref<8xi32, #tpu.memory_space<smem>>
    %29 = arith.index_cast %28 : i32 to index
    %c0_21 = arith.constant 0 : index
    %30 = vector.load %arg1[%29, %c0_21] : memref<128x33xf32, #tpu.memory_space<vmem>>, vector<1x33xf32>
    %c7_22 = arith.constant 7 : index
    %c0_23 = arith.constant 0 : index
    %31 = vector.load %arg6[%c7_22, %c0_23] : memref<8x33xf32, #tpu.memory_space<vmem>>, vector<1x33xf32>
    tpu.vector_store %arg6[%c7_22, %c0_23], %30 {strides = array<i32>} : memref<8x33xf32, #tpu.memory_space<vmem>>, vector<1x33xf32>,
    %c0_24 = arith.constant 0 : index
    %c0_25 = arith.constant 0 : index
    %32 = vector.load %arg6[%c0_24, %c0_25] : memref<8x33xf32, #tpu.memory_space<vmem>>, vector<8x33xf32>
    %33 = arith.truncf %32 : vector<8x33xf32> to vector<8x33xbf16>
    %c0_26 = arith.constant 0 : index
    %c0_27 = arith.constant 0 : index
    %34 = vector.load %arg2[%c0_26, %c0_27] : memref<33x64xbf16, #tpu.memory_space<vmem>>, vector<33x64xbf16>
    %cst = arith.constant dense<0.000000e+00> : vector<8x64xf32>
    %35 = tpu.matmul %33, %34, %cst {dimension_numbers = #tpu.dot_dimension_numbers<[1], [0], [0], [1], [0, 0, 1, 1], [], []>} : vector<8x33xbf16>, vector<33x64xbf16>, vector<8x64xf32> -> vector<8x64xf32>
    %36 = arith.mulf %35, %35 : vector<8x64xf32>
    %37 = arith.mulf %35, %36 : vector<8x64xf32>
    %cst_28 = arith.constant 4.471500e-02 : f32
    %38 = vector.broadcast %cst_28 : f32 to vector<8x64xf32>
    %39 = arith.mulf %38, %37 : vector<8x64xf32>
    %40 = arith.addf %35, %39 : vector<8x64xf32>
    %cst_29 = arith.constant 0.797884583 : f32
    %41 = vector.broadcast %cst_29 : f32 to vector<8x64xf32>
    %42 = arith.mulf %41, %40 : vector<8x64xf32>
    %43 = math.tanh %42 : vector<8x64xf32>
    %cst_30 = arith.constant 1.000000e+00 : f32
    %44 = vector.broadcast %cst_30 : f32 to vector<8x64xf32>
    %45 = arith.addf %44, %43 : vector<8x64xf32>
    %cst_31 = arith.constant 5.000000e-01 : f32
    %46 = vector.broadcast %cst_31 : f32 to vector<8x64xf32>
    %47 = arith.mulf %46, %45 : vector<8x64xf32>
    %48 = arith.mulf %35, %47 : vector<8x64xf32>
    %49 = arith.truncf %48 : vector<8x64xf32> to vector<8x64xbf16>
    %c0_32 = arith.constant 0 : index
    %c0_33 = arith.constant 0 : index
    %50 = vector.load %arg3[%c0_32, %c0_33] : memref<64x128xbf16, #tpu.memory_space<vmem>>, vector<64x128xbf16>
    %cst_34 = arith.constant dense<0.000000e+00> : vector<8x128xf32>
    %51 = tpu.matmul %49, %50, %cst_34 {dimension_numbers = #tpu.dot_dimension_numbers<[1], [0], [0], [1], [0, 0, 1, 1], [], []>} : vector<8x64xbf16>, vector<64x128xbf16>, vector<8x128xf32> -> vector<8x128xf32>
    %c0_35 = arith.constant 0 : index
    %c0_36 = arith.constant 0 : index
    %52 = vector.load %arg4[%c0_35, %c0_36] : memref<1x128xf32, #tpu.memory_space<vmem>>, vector<1x128xf32>
    %53 = vector.broadcast %52 : vector<1x128xf32> to vector<8x128xf32>
    %54 = arith.addf %51, %53 : vector<8x128xf32>
    %c0_37 = arith.constant 0 : index
    %c0_38 = arith.constant 0 : index
    %55 = vector.load %arg5[%c0_37, %c0_38] : memref<8x128xf32, #tpu.memory_space<vmem>>, vector<8x128xf32>
    tpu.vector_store %arg5[%c0_37, %c0_38], %54 {strides = array<i32>} : memref<8x128xf32, #tpu.memory_space<vmem>>, vector<8x128xf32>,
    return
  }
}

</mosaic_0001>

<bundles_post_ra>
// kernel: tpu_custom_call.1
= control target key start
LH: loop header
LB: loop body
LE: loop exit
PB: predicated region body
PF: predicated region fallthrough
CT: control target
= control target key end

     0   :  { %10 = vsyncpa [#allocation5], 0  ;;  %s463_s0 = inlined_call_operand.vmem [shape: s32[8], index: 0, kind: input, shape index: {}]   ;;  %s464_s1 = inlined_call_operand.vmem [shape: f32[128,33], index: 1, kind: input, shape index: {}]   ;;  %s465_s2 = inlined_call_operand.vmem [shape: bf16[33,64], index: 2, kind: input, shape index: {}]   ;;  %s466_s3 = inlined_call_operand.vmem [shape: bf16[64,128], index: 3, kind: input, shape index: {}]   ;;  %s467_s4 = inlined_call_operand.vmem [shape: f32[1,128], index: 4, kind: input, shape index: {}]   ;;  %s468_s5 = inlined_call_operand.hbm [shape: f32[8,128], index: 5, kind: output, shape index: {}]  }
   0x1   :  { %11 = vsyncpa [#allocation4], 0  ;;  %s18_s20 = sshll.u32 %s463_s0, 4  ;;  %s19_s20 = int_to_ptr.vmem [resolvable:$true] %s18_s20 }
   0x2   :  { %s319_s21 = scalar_lea.vmem %s19_s20, 16  ;;  %p324_p1 = scmp.lt.s32.totalorder %s19_s20, %s19_s20 }
   0x3   :  { %p320_p0 = scmp.ne.s32.totalorder %s19_s20, %s319_s21  ;;  %p325_p2 = scmp.lt.s32.totalorder %s319_s21, %s319_s21 }
   0x5   :  { %p326_p3 = por %p325_p2, %p324_p1 }
   0x7   :  { %p327_p4 = pnand %p326_p3, %p320_p0 }
   0x9   :  { %330 = shalt.err (!%p327_p4)
}
   0xa   :  { %s357_s22 = smov [#allocation3]  }
   0xb   :  { %21 = dma.vmem_to_smem %s19_s20, 16, %s357_s22, [#allocation5]  }
   0xc   :  { %353 = dma.done.wait [#allocation5], 16  }
   0xd   :  { %354 = vsyncadd [#allocation5], 4294967280 }
   0xe   :  { %33 = sfence }
   0xf   :  { %v310_v0 = vld [vmem:[%s465_s2] sm:$0xff]   ;;  %v358_v1 = vmov 0.0   ;;  %v311_v2 = vld [vmem:[%s465_s2 + $0x8] sm:$0xff]   ;;  %vm94_vm0 = vcmask 1040384   ;;  %v359_v4 = vmov 0   ;;  %s35_s28 = sld [smem:[#allocation3]] }
  0x10   :  { %283 = vmatprep.subr.bf16.mxu0 %v358_v1  ;;  %293 = vmatprep.subr.bf16.mxu1 %v358_v1  ;;  %v312_v3 = vld [vmem:[%s465_s2 + $0x10] ss:$0 sps:$4 sm:$0x11]   ;;  %v96_v5 = vsel %vm94_vm0, 65535, %v359_v4  ;;  %vm38_vm1 = vcmask 262144   ;;  %vm360_vm2 = vmmov 0  }
  0x11   :  { %284 = vmatpush3.bf16.msra.mxu0 %v310_v0  ;;  %289 = vmatprep.mubr.msk.bf16.mxu0 %vm360_vm2, %v358_v1  ;;  %s257_s29 = sld [smem:[#allocation3 + $0x1]]  ;;  %s258_s30 = sld [smem:[#allocation3 + $0x2]]  ;;  %v98_v6 = vand.u32 %v312_v3, %v96_v5  ;;  %vm90_vm3 = vcmask 269312   ;;  %v313_v17 = vld [vmem:[%s466_s3] sm:$0xff]   ;;  %v314_v18 = vld [vmem:[%s466_s3 + $0x8] sm:$0xff]   ;;  %v315_v19 = vld [vmem:[%s466_s3 + $0x10] sm:$0xff]  }
  0x12   :  { %285 = vmatprep.subr.bf16.mxu0 %v358_v1  ;;  %301 = vmatprep.mubr.msk.bf16.mxu1 %vm360_vm2, %v358_v1  ;;  %s259_s6 = sld [smem:[#allocation3 + $0x3]]  ;;  %s260_s7 = sld [smem:[#allocation3 + $0x4]]  ;;  %v316_v20 = vld [vmem:[%s466_s3 + $0x18] sm:$0xff]   ;;  %vm189_vm4 = vcmask 523264   ;;  %v268_v35 = vld [vmem:[%s467_s4] ss:$0 sm:$0xff] }
  0x13   :  { %s261_s8 = sld [smem:[#allocation3 + $0x5]]  ;;  %s262_s9 = sld [smem:[#allocation3 + $0x6]]  ;;  %294 = vmatpush3.bf16.msra.mxu1 %v313_v17 }
  0x14   :  { %s263_s10 = sld [smem:[#allocation3 + $0x7]]  ;;  %295 = vmatprep.subr.bf16.mxu1 %v358_v1 }
  0x15   :  { %286 = vmatpush3.bf16.msra.mxu0 %v311_v2  ;;  %s36_s12 = scalar_lea.vmem %s464_s1, %s35_s28 }
  0x16   :  { %287 = vmatprep.subr.bf16.mxu0 %v358_v1  ;;  %v37_v7 = vld [vmem:[%s36_s12] sm:$0x1] }
  0x17   :  { %s41_s15 = scalar_lea.vmem %s464_s1, %s257_s29  ;;  %s45_s18 = scalar_lea.vmem %s464_s1, %s258_s30  ;;  %39 = vst.msk [vmem:[#allocation2] sm:$0x1] %vm38_vm1, %v37_v7  ;;  %296 = vmatpush3.bf16.msra.mxu1 %v314_v18 }
  0x18   :  { %v42_v8 = vld [vmem:[%s41_s15] sm:$0x1]  ;;  %s49_s21 = scalar_lea.vmem %s464_s1, %s259_s6  ;;  %s53_s24 = scalar_lea.vmem %s464_s1, %s260_s7  ;;  %297 = vmatprep.subr.bf16.mxu1 %v358_v1 }
  0x19   :  { %288 = vmatpush3.bf16.msra.mxu0 %v98_v6  ;;  %v46_v9 = vld [vmem:[%s45_s18] sm:$0x1]  ;;  %43 = vst.msk [vmem:[#allocation2 + $0x1] sm:$0x1] %vm38_vm1, %v42_v8  ;;  %s57_s26 = scalar_lea.vmem %s464_s1, %s261_s8  ;;  %s61_s29 = scalar_lea.vmem %s464_s1, %s262_s9 }
  0x1a   :  { %47 = vst.msk [vmem:[#allocation2 + $0x2] sm:$0x1] %vm38_vm1, %v46_v9  ;;  %v50_v10 = vld [vmem:[%s49_s21] sm:$0x1]  ;;  %s65_s7 = scalar_lea.vmem %s464_s1, %s263_s10  ;;  %s361_s15 = smov [#allocation6]  }
  0x1b   :  { %v54_v11 = vld [vmem:[%s53_s24] sm:$0x1]  ;;  %51 = vst.msk [vmem:[#allocation2 + $0x3] sm:$0x1] %vm38_vm1, %v50_v10  ;;  %298 = vmatpush3.bf16.msra.mxu1 %v315_v19  ;;  %s240_s16 = sshll.u32 %s361_s15, 4  ;;  %s241_s16 = int_to_ptr.vmem [resolvable:$true] %s240_s16 }
  0x1c   :  { %55 = vst.msk [vmem:[#allocation2 + $0x4] sm:$0x1] %vm38_vm1, %v54_v11  ;;  %v58_v12 = vld [vmem:[%s57_s26] sm:$0x1]  ;;  %299 = vmatprep.subr.bf16.mxu1 %v358_v1  ;;  %s331_s17 = scalar_lea.vmem %s241_s16, 128  ;;  %p336_p6 = scmp.lt.s32.totalorder %s241_s16, %s241_s16 }
  0x1d   :  { %v62_v13 = vld [vmem:[%s61_s29] sm:$0x1]  ;;  %59 = vst.msk [vmem:[#allocation2 + $0x5] sm:$0x1] %vm38_vm1, %v58_v12  ;;  %p332_p5 = scmp.ne.s32.totalorder %s241_s16, %s331_s17  ;;  %p337_p7 = scmp.lt.s32.totalorder %s331_s17, %s331_s17 }
  0x1e   :  { %63 = vst.msk [vmem:[#allocation2 + $0x6] sm:$0x1] %vm38_vm1, %v62_v13  ;;  %v66_v14 = vld [vmem:[%s65_s7] sm:$0x1] }
  0x1f   :  { %67 = vst.msk [vmem:[#allocation2 + $0x7] sm:$0x1] %vm38_vm1, %v66_v14  ;;  %300 = vmatpush3.bf16.msra.mxu1 %v316_v20  ;;  %p338_p8 = por %p337_p7, %p336_p6 }
  0x21   :  { %p339_p9 = pnand %p338_p8, %p332_p5 }
  0x26   :  { %v68_v15 = vld [vmem:[#allocation2] sm:$0xff] }
  0x27   :  { %v69_v16 = vpack.c.bf16 %v68_v15, %v68_v15 }
  0x29   :  { %290 = vmatmul.mubr.msk.bf16.vlgmr.msra.gmra.mrb[0].mxu0 %vm90_vm3, %v69_v16 }
  0xfc   :  { %v134_v21 = vpop.f32.mrb[0].mxu0 }
  0xfd   :  { %v140_v22 = vmul.f32 %v134_v21, %v134_v21  ;;  %v291_v23 = vpop.f32.mrb[1].mxu0 }
  0xfe   :  { %v137_v24 = vpop.f32.mrb[2].mxu0 }
  0xff   :  { %v141_v25 = vmul.f32 %v140_v22, %v134_v21  ;;  %v292_v26 = vpop.f32.mrb[3].mxu0 }
 0x101   :  { %v142_v27 = vmul.f32 0.044715, %v141_v25 }
 0x103   :  { %v143_v28 = vadd.f32 %v142_v27, %v134_v21 }
 0x105   :  { %v144_v29 = vmul.f32 0.7978846, %v143_v28 }
 0x107   :  { %317 = vtanh.f32 %v144_v29 }
 0x111   :  { %v318_v30 = vpop.eup %317 }
 0x112   :  { %v146_v31 = vadd.f32 1.0, %v318_v30 }
 0x114   :  { %v147_v32 = vmul.f32 0.5, %v146_v31 }
 0x116   :  { %v148_v33 = vmul.f32 %v147_v32, %v134_v21 }
 0x118   :  { %v149_v34 = vpack.c.bf16 %v148_v33, %v148_v33 }
 0x11a   :  { %302 = vmatmul.mubr.msk.bf16.vlgmr.msra.gmra.mrb[0].mxu1 %vm189_vm4, %v149_v34 }
 0x1ed   :  { %v227_v36 = vpop.f32.mrb[0].mxu1 }
 0x1ee   :  { %v228_v37 = vadd.f32 %v268_v35, %v227_v36  ;;  %v303_v38 = vpop.f32.mrb[1].mxu1 }
 0x1ef   :  { %v230_v39 = vpop.f32.mrb[2].mxu1 }
 0x1f0   :  { %233 = vst [vmem:[#allocation6] sm:$0xff] %v228_v37  ;;  %v304_v40 = vpop.f32.mrb[3].mxu1 }
 0x1f1   :  { %342 = shalt.err (!%p339_p9)
}
 0x1f2   :  { %s343_s4 = scalar_lea.hbm %s468_s5, 128 }
 0x1f3   :  { %p344_p10 = scmp.ne.s32.totalorder %s468_s5, %s343_s4  ;;  %p347_p11 = scmp.lt.u32.totalorder %s343_s4, %s468_s5 }
 0x1f5   :  { %p349_p12 = pnand %p347_p11, %p344_p10 }
 0x1f7   :  { %352 = shalt.err (!%p349_p12)
}
 0x1f8   :  { %243 = dma.vmem_to_hbm [thread:$0]  %s241_s16, 128, %s468_s5, [#allocation4]  }
 0x1f9   :  { %355 = dma.done.wait [#allocation4], 128  }
 0x1fa   :  { %356 = vsyncadd [#allocation4], 4294967168 }
 0x1fb   :  { %247 = vsyncpa [#allocation4], 1 }
 0x1fc   :  { %248 = vsyncpa [#allocation5], 1 }

</bundles_post_ra>
